<compile_context>
chip_gen: v5e
topology: v5e:2x2
jax: 0.10.0
libtpu: 0.0.40
codegen_flags: <defaults>
</compile_context>

<pallas_src>
import functools

import jax
import jax.numpy as jnp
from jax.experimental import pallas as pl
from jax.experimental.pallas import tpu as pltpu


def _round_up(n, m):
    return ((n + m - 1) // m) * m


# ----------------------------- Pallas kernel --------------------------------
def _dualnet_kernel(x_ref, w1_ref, b1_ref, w2_ref, b2_ref, wh_ref, bh_ref,
                    out_ref):
    # hidden layer 1: Linear + ReLU (f32 accumulation on the MXU)
    h1 = jnp.dot(x_ref[...], w1_ref[...], preferred_element_type=jnp.float32)
    h1 = jnp.maximum(h1 + b1_ref[...], 0.0).astype(w2_ref.dtype)
    # hidden layer 2: Linear + ReLU
    h2 = jnp.dot(h1, w2_ref[...], preferred_element_type=jnp.float32)
    h2 = jnp.maximum(h2 + b2_ref[...], 0.0).astype(wh_ref.dtype)
    # fused output heads (mu ++ lamb, zero-padded to 128 lanes):
    # one MXU matmul + one unmasked, lane-dense store.
    out = jnp.dot(h2, wh_ref[...], preferred_element_type=jnp.float32)
    out_ref[...] = (out + bh_ref[...]).astype(out_ref.dtype)


# --------------------- one-time parameter packing (cold path) ----------------
def prepare_params(params, *, use_bf16=False):
    """Cast / fuse heads / lane-pad ONCE.  Do not call per forward step.

    params: dict with w1[xdim,H], b1[1,H], w2[H,H], b2[1,H],
            wmu[H,nineq], bmu[1,nineq], wlamb[H,neq], blamb[1,neq]
            (Linear weights pre-transposed to [in, out]).
    Returns (packed_arrays_dict, (nineq, neq)).
    """
    w_dtype = jnp.bfloat16 if use_bf16 else jnp.float32
    xdim, H = params["w1"].shape
    nineq = params["wmu"].shape[1]
    neq = params["wlamb"].shape[1]
    n_out = nineq + neq

    H_pad = _round_up(H, 128)
    n_pad = _round_up(max(n_out, 1), 128)

    w1, b1 = params["w1"], params["b1"]
    w2, b2 = params["w2"], params["b2"]
    w_head = jnp.concatenate([params["wmu"], params["wlamb"]], axis=1)
    b_head = jnp.concatenate([params["bmu"], params["blamb"]], axis=1)

    if H_pad != H:  # keep all three matmuls lane-dense for odd hidden sizes
        dh = H_pad - H
        w1 = jnp.pad(w1, ((0, 0), (0, dh)))
        b1 = jnp.pad(b1, ((0, 0), (0, dh)))
        w2 = jnp.pad(w2, ((0, dh), (0, dh)))
        b2 = jnp.pad(b2, ((0, 0), (0, dh)))
        w_head = jnp.pad(w_head, ((0, dh), (0, 0)))
    if n_pad != n_out:
        w_head = jnp.pad(w_head, ((0, 0), (0, n_pad - n_out)))
        b_head = jnp.pad(b_head, ((0, 0), (0, n_pad - n_out)))

    packed = {
        "w1": w1.astype(w_dtype), "b1": b1.astype(jnp.float32),
        "w2": w2.astype(w_dtype), "b2": b2.astype(jnp.float32),
        "w_head": w_head.astype(w_dtype), "b_head": b_head.astype(jnp.float32),
    }
    return packed, (nineq, neq)


# ------------------------------ host wrapper ---------------------------------
@functools.partial(jax.jit, static_argnames=("nineq", "neq", "batch_tile"))
def dualnet_forward(x, packed, *, nineq, neq, batch_tile=256):
    """Fused MLP + two output heads in a single pallas_call.

    x:      [B, xdim] float32
    packed: output of prepare_params()
    Returns (out_mu [B, nineq], out_lamb [B, neq]) in float32.
    """
    B, xdim = x.shape
    H = packed["w1"].shape[1]          # lane-padded hidden size
    n_pad = packed["w_head"].shape[1]  # lane-padded fused head width
    n_out = nineq + neq
    w_dtype = packed["w1"].dtype
    xin = x.astype(w_dtype)

    # --- batch tile selection ------------------------------------------------
    batch_tile = max(128, _round_up(batch_tile, 128))
    align = 16 if w_dtype == jnp.bfloat16 else 8   # bf16 packs 2 rows/sublane
    if B <= 128:
        bt = max(align, _round_up(B, align))       # one small aligned tile
    else:
        # Aim for >= 2 grid steps so the "parallel" batch axis can shard
        # across both TensorCores on v7x; cap at batch_tile (256 default).
        bt = min(batch_tile, max(128, _round_up(pl.cdiv(B, 2), 128)))
    B_pad = _round_up(B, bt)
    if B_pad != B:
        xin = jnp.pad(xin, ((0, B_pad - B), (0, 0)))
    grid = (B_pad // bt,)

    # Weights/biases: whole array resident in VMEM, single-buffered (no
    # per-step re-fetch, no pipeline double-buffering of the big w2 block).
    resident = pl.BlockSpec(memory_space=pltpu.MemorySpace.VMEM)
    x_map = lambda i: (i, 0)

    # --- explicit scoped-VMEM budget ------------------------------------------
    nbytes = lambda a: a.size * a.dtype.itemsize
    weight_bytes = sum(nbytes(packed[k]) for k in packed)
    x_tile_bytes = 2 * bt * xdim * xin.dtype.itemsize        # double-buffered
    out_tile_bytes = 2 * bt * n_pad * 4                      # double-buffered
    need = int(1.25 * (weight_bytes + x_tile_bytes + out_tile_bytes)) + (2 << 20)
    # Floor at the v6e/v7x default (32 MiB); cap at v7x physical VMEM (64 MiB).
    vmem_limit = min(max(need, 32 << 20), 64 << 20)

    cost = pl.CostEstimate(
        flops=2 * B_pad * (xdim * H + H * H + H * n_pad),
        transcendentals=0,
        bytes_accessed=nbytes(xin) + weight_bytes + B_pad * n_pad * 4)

    out_padded = pl.pallas_call(
        _dualnet_kernel,
        out_shape=jax.ShapeDtypeStruct((B_pad, n_pad), jnp.float32),
        grid=grid,
        in_specs=[
            pl.BlockSpec((bt, xdim), x_map),   # x        (tiled over batch)
            resident,                          # w1       [xdim, H]
            resident,                          # b1       [1, H]
            resident,                          # w2       [H, H]
            resident,                          # b2       [1, H]
            resident,                          # w_head   [H, n_pad]
            resident,                          # b_head   [1, n_pad]
        ],
        out_specs=pl.BlockSpec((bt, n_pad), x_map),
        compiler_params=pltpu.CompilerParams(
            dimension_semantics=("parallel",),
            vmem_limit_bytes=vmem_limit),
        cost_estimate=cost,
    )(xin, packed["w1"], packed["b1"], packed["w2"], packed["b2"],
      packed["w_head"], packed["b_head"])

    out_mu = out_padded[:B, :nineq]
    out_lamb = out_padded[:B, nineq:n_out]
    return out_mu, out_lamb


# --------------------------- parameter construction --------------------------
def init_params(key, xdim, hidden, nineq, neq):
    """Init mirroring the PyTorch module's __init__.

    - Hidden Linear weights: kaiming_normal_ (std = sqrt(2 / fan_in)).
    - Hidden Linear biases: PyTorch default uniform(+-1/sqrt(fan_in)).
    - Output heads (mu, lamb): weights and biases zeroed (as in the module).
    Weights stored as [in, out] (transposed w.r.t. nn.Linear's [out, in]).
    """
    k1, k2, k3, k4 = jax.random.split(key, 4)

    def kaiming(k, fan_in, fan_out):
        std = jnp.sqrt(2.0 / fan_in)
        return std * jax.random.normal(k, (fan_in, fan_out), dtype=jnp.float32)

    def uniform_bias(k, fan_in, fan_out):
        bound = 1.0 / jnp.sqrt(float(fan_in))
        return jax.random.uniform(k, (1, fan_out), minval=-bound, maxval=bound,
                                  dtype=jnp.float32)

    return {
        "w1": kaiming(k1, xdim, hidden),
        "b1": uniform_bias(k2, xdim, hidden),
        "w2": kaiming(k3, hidden, hidden),
        "b2": uniform_bias(k4, hidden, hidden),
        "wmu": jnp.zeros((hidden, nineq), jnp.float32),
        "bmu": jnp.zeros((1, nineq), jnp.float32),
        "wlamb": jnp.zeros((hidden, neq), jnp.float32),
        "blamb": jnp.zeros((1, neq), jnp.float32),
    }


def reference_forward(x, p):
    hi = jax.lax.Precision.HIGHEST
    h = jnp.maximum(jnp.dot(x, p["w1"], precision=hi) + p["b1"], 0.0)
    h = jnp.maximum(jnp.dot(h, p["w2"], precision=hi) + p["b2"], 0.0)
    return (jnp.dot(h, p["wmu"], precision=hi) + p["bmu"],
            jnp.dot(h, p["wlamb"], precision=hi) + p["blamb"])


if __name__ == "__main__":
    # Small shapes consistent with the module (data.xdim, hidden_size,
    # data.nineq, data.neq).  hidden=32 also exercises the H->128 lane padding.
    batch, xdim, hidden, nineq, neq = 8, 16, 32, 8, 4

    key = jax.random.PRNGKey(0)
    kx, kp, kh = jax.random.split(key, 3)
    x = jax.random.normal(kx, (batch, xdim), dtype=jnp.float32)
    params = init_params(kp, xdim, hidden, nineq, neq)

    # The module zero-inits the heads (outputs would be all-zero), so for the
    # numerical self-test use nonzero random head weights to actually exercise
    # the head matmul path.
    k1, k2, k3, k4 = jax.random.split(kh, 4)
    test_params = dict(params)
    test_params["wmu"] = 0.1 * jax.random.normal(k1, (hidden, nineq), jnp.float32)
    test_params["bmu"] = 0.1 * jax.random.normal(k2, (1, nineq), jnp.float32)
    test_params["wlamb"] = 0.1 * jax.random.normal(k3, (hidden, neq), jnp.float32)
    test_params["blamb"] = 0.1 * jax.random.normal(k4, (1, neq), jnp.float32)

    # One-time packing (cold path), f32 and bf16 variants.
    packed_f32, (ni, ne) = prepare_params(test_params, use_bf16=False)
    packed_bf16, _ = prepare_params(test_params, use_bf16=True)
    packed_zero, _ = prepare_params(params, use_bf16=False)

    # Case 1: tiny batch -> single 8-aligned grid step.
    out_mu, out_lamb = dualnet_forward(x, packed_f32, nineq=ni, neq=ne)
    out_mu, out_lamb = jax.block_until_ready((out_mu, out_lamb))
    ref_mu, ref_lamb = reference_forward(x, test_params)
    assert out_mu.shape == (batch, nineq) and out_lamb.shape == (batch, neq)
    assert jnp.allclose(out_mu, ref_mu, atol=1e-2, rtol=1e-2)
    assert jnp.allclose(out_lamb, ref_lamb, atol=1e-2, rtol=1e-2)

    # Case 2: non-tile-aligned larger batch -> batch padding + a 2-step
    # "parallel" grid (both TensorCores on v7x).
    big_b = 200
    xb = jax.random.normal(kx, (big_b, xdim), dtype=jnp.float32)
    mu2, lamb2 = dualnet_forward(xb, packed_f32, nineq=ni, neq=ne,
                                 batch_tile=256)
    mu2, lamb2 = jax.block_until_ready((mu2, lamb2))
    rmu2, rlamb2 = reference_forward(xb, test_params)
    assert mu2.shape == (big_b, nineq) and lamb2.shape == (big_b, neq)
    assert jnp.allclose(mu2, rmu2, atol=1e-2, rtol=1e-2)
    assert jnp.allclose(lamb2, rlamb2, atol=1e-2, rtol=1e-2)

    # Case 3: bf16 weight/activation path (f32 accumulation) — loose tolerance.
    mu3, lamb3 = dualnet_forward(x, packed_bf16, nineq=ni, neq=ne)
    mu3, lamb3 = jax.block_until_ready((mu3, lamb3))
    assert jnp.allclose(mu3, ref_mu, atol=5e-2, rtol=5e-2)
    assert jnp.allclose(lamb3, ref_lamb, atol=5e-2, rtol=5e-2)

    # Case 4: zero-initialized heads exactly as in the PyTorch module ->
    # outputs must be exactly zero.
    zmu, zlamb = dualnet_forward(x, packed_zero, nineq=ni, neq=ne)
    zmu, zlamb = jax.block_until_ready((zmu, zlamb))
    assert jnp.allclose(zmu, 0.0) and jnp.allclose(zlamb, 0.0)

    print("KERNEL_OK")
</pallas_src>

<mosaic_0001>
module attributes {stable_mosaic.version = 11 : i64} {
  func.func @_dualnet_kernel(%arg0: i32, %arg1: memref<8x16xf32, #tpu.memory_space<vmem>>, %arg2: memref<16x128xf32, #tpu.memory_space<vmem>>, %arg3: memref<1x128xf32, #tpu.memory_space<vmem>>, %arg4: memref<128x128xf32, #tpu.memory_space<vmem>>, %arg5: memref<1x128xf32, #tpu.memory_space<vmem>>, %arg6: memref<128x128xf32, #tpu.memory_space<vmem>>, %arg7: memref<1x128xf32, #tpu.memory_space<vmem>>, %arg8: memref<8x128xf32, #tpu.memory_space<vmem>>) attributes {dimension_semantics = [#tpu.dimension_semantics<parallel>], iteration_bounds = array<i64: 1>, scalar_prefetch = 0 : i64, scratch_operands = 0 : i64, tpu.core_type = #tpu.core_type<tc>, window_params = [{transform_indices = @transform_0, window_bounds = array<i64: 8, 16>}, {pipeline_mode = #tpu.pipeline_mode<synchronous>, transform_indices = @transform_1, window_bounds = array<i64: 16, 128>}, {pipeline_mode = #tpu.pipeline_mode<synchronous>, transform_indices = @transform_2, window_bounds = array<i64: 1, 128>}, {pipeline_mode = #tpu.pipeline_mode<synchronous>, transform_indices = @transform_3, window_bounds = array<i64: 128, 128>}, {pipeline_mode = #tpu.pipeline_mode<synchronous>, transform_indices = @transform_4, window_bounds = array<i64: 1, 128>}, {pipeline_mode = #tpu.pipeline_mode<synchronous>, transform_indices = @transform_5, window_bounds = array<i64: 128, 128>}, {pipeline_mode = #tpu.pipeline_mode<synchronous>, transform_indices = @transform_6, window_bounds = array<i64: 1, 128>}, {transform_indices = @transform_7, window_bounds = array<i64: 8, 128>}]} {
    %c0 = arith.constant 0 : index
    %c0_0 = arith.constant 0 : index
    %0 = vector.load %arg1[%c0, %c0_0] : memref<8x16xf32, #tpu.memory_space<vmem>>, vector<8x16xf32>
    %c0_1 = arith.constant 0 : index
    %c0_2 = arith.constant 0 : index
    %1 = vector.load %arg2[%c0_1, %c0_2] : memref<16x128xf32, #tpu.memory_space<vmem>>, vector<16x128xf32>
    %cst = arith.constant dense<0.000000e+00> : vector<8x128xf32>
    %2 = tpu.matmul %0, %1, %cst {dimension_numbers = #tpu.dot_dimension_numbers<[1], [0], [0], [1], [0, 0, 1, 1], [], []>} : vector<8x16xf32>, vector<16x128xf32>, vector<8x128xf32> -> vector<8x128xf32>
    %c0_3 = arith.constant 0 : index
    %c0_4 = arith.constant 0 : index
    %3 = vector.load %arg3[%c0_3, %c0_4] : memref<1x128xf32, #tpu.memory_space<vmem>>, vector<1x128xf32>
    %4 = vector.broadcast %3 : vector<1x128xf32> to vector<8x128xf32>
    %5 = arith.addf %2, %4 : vector<8x128xf32>
    %cst_5 = arith.constant 0.000000e+00 : f32
    %6 = vector.broadcast %cst_5 : f32 to vector<8x128xf32>
    %7 = arith.maximumf %5, %6 : vector<8x128xf32>
    %c0_6 = arith.constant 0 : index
    %c0_7 = arith.constant 0 : index
    %8 = vector.load %arg4[%c0_6, %c0_7] : memref<128x128xf32, #tpu.memory_space<vmem>>, vector<128x128xf32>
    %cst_8 = arith.constant dense<0.000000e+00> : vector<8x128xf32>
    %9 = tpu.matmul %7, %8, %cst_8 {dimension_numbers = #tpu.dot_dimension_numbers<[1], [0], [0], [1], [0, 0, 1, 1], [], []>} : vector<8x128xf32>, vector<128x128xf32>, vector<8x128xf32> -> vector<8x128xf32>
    %c0_9 = arith.constant 0 : index
    %c0_10 = arith.constant 0 : index
    %10 = vector.load %arg5[%c0_9, %c0_10] : memref<1x128xf32, #tpu.memory_space<vmem>>, vector<1x128xf32>
    %11 = vector.broadcast %10 : vector<1x128xf32> to vector<8x128xf32>
    %12 = arith.addf %9, %11 : vector<8x128xf32>
    %cst_11 = arith.constant 0.000000e+00 : f32
    %13 = vector.broadcast %cst_11 : f32 to vector<8x128xf32>
    %14 = arith.maximumf %12, %13 : vector<8x128xf32>
    %c0_12 = arith.constant 0 : index
    %c0_13 = arith.constant 0 : index
    %15 = vector.load %arg6[%c0_12, %c0_13] : memref<128x128xf32, #tpu.memory_space<vmem>>, vector<128x128xf32>
    %cst_14 = arith.constant dense<0.000000e+00> : vector<8x128xf32>
    %16 = tpu.matmul %14, %15, %cst_14 {dimension_numbers = #tpu.dot_dimension_numbers<[1], [0], [0], [1], [0, 0, 1, 1], [], []>} : vector<8x128xf32>, vector<128x128xf32>, vector<8x128xf32> -> vector<8x128xf32>
    %c0_15 = arith.constant 0 : index
    %c0_16 = arith.constant 0 : index
    %17 = vector.load %arg7[%c0_15, %c0_16] : memref<1x128xf32, #tpu.memory_space<vmem>>, vector<1x128xf32>
    %18 = vector.broadcast %17 : vector<1x128xf32> to vector<8x128xf32>
    %19 = arith.addf %16, %18 : vector<8x128xf32>
    %c0_17 = arith.constant 0 : index
    %c0_18 = arith.constant 0 : index
    %20 = vector.load %arg8[%c0_17, %c0_18] : memref<8x128xf32, #tpu.memory_space<vmem>>, vector<8x128xf32>
    tpu.vector_store %arg8[%c0_17, %c0_18], %19 {strides = array<i32>} : memref<8x128xf32, #tpu.memory_space<vmem>>, vector<8x128xf32>,
    return
  }
  func.func @transform_0(%arg0: i32) -> (i32, i32) {
    %c0_i32 = arith.constant 0 : i32
    %c0_i32_0 = arith.constant 0 : i32
    return %arg0, %c0_i32 : i32, i32
  }
  func.func @transform_1(%arg0: i32) -> (i32, i32) {
    %c0_i32 = arith.constant 0 : i32
    %c0_i32_0 = arith.constant 0 : i32
    %c0_i32_1 = arith.constant 0 : i32
    return %c0_i32, %c0_i32_0 : i32, i32
  }
  func.func @transform_2(%arg0: i32) -> (i32, i32) {
    %c0_i32 = arith.constant 0 : i32
    %c0_i32_0 = arith.constant 0 : i32
    %c0_i32_1 = arith.constant 0 : i32
    return %c0_i32, %c0_i32_0 : i32, i32
  }
  func.func @transform_3(%arg0: i32) -> (i32, i32) {
    %c0_i32 = arith.constant 0 : i32
    %c0_i32_0 = arith.constant 0 : i32
    %c0_i32_1 = arith.constant 0 : i32
    return %c0_i32, %c0_i32_0 : i32, i32
  }
  func.func @transform_4(%arg0: i32) -> (i32, i32) {
    %c0_i32 = arith.constant 0 : i32
    %c0_i32_0 = arith.constant 0 : i32
    %c0_i32_1 = arith.constant 0 : i32
    return %c0_i32, %c0_i32_0 : i32, i32
  }
  func.func @transform_5(%arg0: i32) -> (i32, i32) {
    %c0_i32 = arith.constant 0 : i32
    %c0_i32_0 = arith.constant 0 : i32
    %c0_i32_1 = arith.constant 0 : i32
    return %c0_i32, %c0_i32_0 : i32, i32
  }
  func.func @transform_6(%arg0: i32) -> (i32, i32) {
    %c0_i32 = arith.constant 0 : i32
    %c0_i32_0 = arith.constant 0 : i32
    %c0_i32_1 = arith.constant 0 : i32
    return %c0_i32, %c0_i32_0 : i32, i32
  }
  func.func @transform_7(%arg0: i32) -> (i32, i32) {
    %c0_i32 = arith.constant 0 : i32
    %c0_i32_0 = arith.constant 0 : i32
    return %arg0, %c0_i32 : i32, i32
  }
}

</mosaic_0001>

<bundles_post_ra>
// kernel: dualnet_forward.1
= control target key start
LH: loop header
LB: loop body
LE: loop exit
PB: predicated region body
PF: predicated region fallthrough
CT: control target
= control target key end

     0   :  { %12 = vsyncpa [#allocation3], 0  ;;  %s429_s0 = inlined_call_operand.hbm [shape: f32[8,16], index: 0, kind: input, shape index: {}]   ;;  %s430_s1 = inlined_call_operand.hbm [shape: f32[16,128], index: 1, kind: input, shape index: {}]   ;;  %s431_s2 = inlined_call_operand.hbm [shape: f32[1,128], index: 2, kind: input, shape index: {}]   ;;  %s432_s3 = inlined_call_operand.hbm [shape: f32[128,128], index: 3, kind: input, shape index: {}]   ;;  %s433_s4 = inlined_call_operand.vmem [shape: f32[1,128], index: 4, kind: input, shape index: {}]   ;;  %s434_s5 = inlined_call_operand.hbm [shape: f32[128,128], index: 5, kind: input, shape index: {}]   ;;  %s435_s6 = inlined_call_operand.vmem [shape: f32[1,128], index: 6, kind: input, shape index: {}]   ;;  %s436_s7 = inlined_call_operand.vmem [shape: f32[8,128], index: 7, kind: output, shape index: {}]  }
   0x1   :  { %13 = vsyncpa [#allocation5], 0  ;;  %s30_s26 = sshll.u32 %s430_s1, 4  ;;  %s31_s26 = int_to_ptr.hbm [resolvable:$true] %s30_s26 }
   0x2   :  { %14 = vsyncpa [#allocation8], 0  ;;  %s358_s27 = smov [#allocation4]   ;;  %s54_s8 = sshll.u32 %s432_s3, 4  ;;  %s55_s8 = int_to_ptr.hbm [resolvable:$true] %s54_s8 }
   0x3   :  { %s32_s28 = sshll.u32 %s358_s27, 4  ;;  %s359_s9 = smov 128   ;;  %s33_s28 = int_to_ptr.vmem [resolvable:$true] %s32_s28 }
   0x4   :  { %s360_s10 = smov 8   ;;  %s361_s11 = smov [#allocation7]  }
   0x5   :  { %38 = dma.hbm_to_vmem [thread:$0]  %s31_s26, 256, %s33_s28, [#allocation5], %s359_s9, %s359_s9, %s360_s10  }
   0x6   :  { %s56_s12 = sshll.u32 %s361_s11, 4  ;;  %s20_s15 = sshll.u32 %s429_s0, 4  ;;  %s57_s12 = int_to_ptr.vmem [resolvable:$true] %s56_s12  ;;  %s21_s15 = int_to_ptr.hbm [resolvable:$true] %s20_s15 }
   0x7   :  { %62 = dma.hbm_to_vmem [thread:$0]  %s55_s8, 2048, %s57_s12, [#allocation8], %s359_s9, %s359_s9, %s360_s10  }
   0x8   :  { %s44_s17 = sshll.u32 %s431_s2, 4  ;;  %s362_s18 = smov [#allocation2]   ;;  %s45_s17 = int_to_ptr.hbm [resolvable:$true] %s44_s17 }
   0x9   :  { %s22_s19 = sshll.u32 %s362_s18, 4  ;;  %s363_s3 = smov [#allocation6]   ;;  %s23_s19 = int_to_ptr.vmem [resolvable:$true] %s22_s19 }
   0xa   :  { %25 = dma.hbm_to_vmem [thread:$0]  %s21_s15, 128, %s23_s19, [#allocation3]  }
   0xb   :  { %s46_s20 = sshll.u32 %s363_s3, 4  ;;  %s69_s23 = sshll.u32 %s434_s5, 4  ;;  %s47_s20 = int_to_ptr.vmem [resolvable:$true] %s46_s20  ;;  %s70_s23 = int_to_ptr.hbm [resolvable:$true] %s69_s23 }
   0xc   :  { %49 = dma.hbm_to_vmem [thread:$0]  %s45_s17, 16, %s47_s20, [#allocation5]  }
   0xd   :  { %s364_s0 = smov [#allocation9]  }
   0xe   :  { %s71_s24 = sshll.u32 %s364_s0, 4  ;;  %s72_s24 = int_to_ptr.vmem [resolvable:$true] %s71_s24 }
   0xf   :  { %77 = dma.hbm_to_vmem [thread:$0]  %s70_s23, 2048, %s72_s24, [#allocation8], %s359_s9, %s359_s9, %s360_s10  }
  0x10   :  { %352 = dma.done.wait [#allocation3], 128  }
  0x11   :  { %353 = vsyncadd [#allocation3], 4294967168 }
  0x12   :  { %354 = dma.done.wait [#allocation5], 272  }
  0x13   :  { %355 = vsyncadd [#allocation5], 4294967024 }
  0x14   :  { %356 = dma.done.wait [#allocation8], 4096  }
  0x15   :  { %357 = vsyncadd [#allocation8], 4294963200  ;;  %v102_v0 = vld [vmem:[#allocation4 + $0x8] sm:$0xff]  ;;  %v101_v1 = vld [vmem:[#allocation4] sm:$0xff]  ;;  %vm107_vm0 = vcmask 130048  }
  0x16   :  { %125 = vmatpush.msra.mxu0 %v102_v0  ;;  %v100_v2 = vld [vmem:[#allocation2] sm:$0xff]  ;;  %v147_v3 = vld [vmem:[#allocation7 + $0x78] sm:$0xff]  ;;  %v146_v4 = vld [vmem:[#allocation7 + $0x70] sm:$0xff] }
  0x17   :  { %152 = vmatpush.msra.mxu1 %v147_v3  ;;  %v145_v5 = vld [vmem:[#allocation7 + $0x68] sm:$0xff]  ;;  %v144_v6 = vld [vmem:[#allocation7 + $0x60] sm:$0xff]  ;;  %v143_v7 = vld [vmem:[#allocation7 + $0x58] sm:$0xff] }
  0x18   :  { %126 = vmatpush.msra.mxu0 %v101_v1  ;;  %v142_v8 = vld [vmem:[#allocation7 + $0x50] sm:$0xff]  ;;  %v141_v9 = vld [vmem:[#allocation7 + $0x48] sm:$0xff]  ;;  %v140_v10 = vld [vmem:[#allocation7 + $0x40] sm:$0xff] }
  0x19   :  { %221 = vmatmul.msk.f32.vlgmr.msra.gmra.mxu0 %vm107_vm0, %v100_v2  ;;  %153 = vmatpush.msra.mxu1 %v146_v4  ;;  %v139_v11 = vld [vmem:[#allocation7 + $0x38] sm:$0xff]  ;;  %v138_v12 = vld [vmem:[#allocation7 + $0x30] sm:$0xff]  ;;  %v137_v13 = vld [vmem:[#allocation7 + $0x28] sm:$0xff] }
  0x1a   :  { %v136_v14 = vld [vmem:[#allocation7 + $0x20] sm:$0xff]  ;;  %v135_v15 = vld [vmem:[#allocation7 + $0x18] sm:$0xff]  ;;  %v134_v16 = vld [vmem:[#allocation7 + $0x10] sm:$0xff] }
  0x1b   :  { %154 = vmatpush.msra.mxu1 %v145_v5  ;;  %v133_v17 = vld [vmem:[#allocation7 + $0x8] sm:$0xff]  ;;  %v132_v18 = vld [vmem:[#allocation7] sm:$0xff]  ;;  %v188_v19 = vld [vmem:[#allocation9 + $0x78] sm:$0xff] }
  0x1c   :  { %v187_v20 = vld [vmem:[#allocation9 + $0x70] sm:$0xff]  ;;  %193 = vmatpush.msra.mxu2 %v188_v19  ;;  %v186_v21 = vld [vmem:[#allocation9 + $0x68] sm:$0xff]  ;;  %v185_v22 = vld [vmem:[#allocation9 + $0x60] sm:$0xff] }
  0x1d   :  { %155 = vmatpush.msra.mxu1 %v144_v6  ;;  %v184_v23 = vld [vmem:[#allocation9 + $0x58] sm:$0xff]  ;;  %v183_v24 = vld [vmem:[#allocation9 + $0x50] sm:$0xff]  ;;  %v182_v25 = vld [vmem:[#allocation9 + $0x48] sm:$0xff] }
  0x1e   :  { %194 = vmatpush.msra.mxu2 %v187_v20  ;;  %v181_v26 = vld [vmem:[#allocation9 + $0x40] sm:$0xff]  ;;  %v180_v27 = vld [vmem:[#allocation9 + $0x38] sm:$0xff]  ;;  %v179_v28 = vld [vmem:[#allocation9 + $0x30] sm:$0xff] }
  0x1f   :  { %156 = vmatpush.msra.mxu1 %v143_v7  ;;  %v178_v29 = vld [vmem:[#allocation9 + $0x28] sm:$0xff]  ;;  %v177_v30 = vld [vmem:[#allocation9 + $0x20] sm:$0xff]  ;;  %v176_v31 = vld [vmem:[#allocation9 + $0x18] sm:$0xff] }
  0x20   :  { %195 = vmatpush.msra.mxu2 %v186_v21  ;;  %v229_v32 = vld [vmem:[#allocation6] ss:$0 sm:$0xff]  ;;  %v175_v36 = vld [vmem:[#allocation9 + $0x10] sm:$0xff]  ;;  %v174_v37 = vld [vmem:[#allocation9 + $0x8] sm:$0xff] }
  0x21   :  { %157 = vmatpush.msra.mxu1 %v142_v8  ;;  %v173_v38 = vld [vmem:[#allocation9] sm:$0xff] }
  0x22   :  { %196 = vmatpush.msra.mxu2 %v185_v22  ;;  %v230_v39 = vld [vmem:[%s433_s4] ss:$0 sm:$0xff] }
  0x23   :  { %158 = vmatpush.msra.mxu1 %v141_v9  ;;  %v231_v43 = vld [vmem:[%s435_s6] ss:$0 sm:$0xff] }
  0x24   :  { %197 = vmatpush.msra.mxu2 %v184_v23 }
  0x25   :  { %159 = vmatpush.msra.mxu1 %v140_v10 }
  0x26   :  { %198 = vmatpush.msra.mxu2 %v183_v24 }
  0x27   :  { %160 = vmatpush.msra.mxu1 %v139_v11 }
  0x28   :  { %199 = vmatpush.msra.mxu2 %v182_v25 }
  0x29   :  { %161 = vmatpush.msra.mxu1 %v138_v12 }
  0x2a   :  { %200 = vmatpush.msra.mxu2 %v181_v26 }
  0x2b   :  { %162 = vmatpush.msra.mxu1 %v137_v13 }
  0x2c   :  { %201 = vmatpush.msra.mxu2 %v180_v27 }
  0x2d   :  { %163 = vmatpush.msra.mxu1 %v136_v14 }
  0x2e   :  { %202 = vmatpush.msra.mxu2 %v179_v28 }
  0x2f   :  { %164 = vmatpush.msra.mxu1 %v135_v15 }
  0x30   :  { %203 = vmatpush.msra.mxu2 %v178_v29 }
  0x31   :  { %165 = vmatpush.msra.mxu1 %v134_v16 }
  0x32   :  { %204 = vmatpush.msra.mxu2 %v177_v30 }
  0x33   :  { %166 = vmatpush.msra.mxu1 %v133_v17 }
  0x34   :  { %205 = vmatpush.msra.mxu2 %v176_v31 }
  0x35   :  { %167 = vmatpush.msra.mxu1 %v132_v18 }
  0x36   :  { %206 = vmatpush.msra.mxu2 %v175_v36 }
  0x38   :  { %207 = vmatpush.msra.mxu2 %v174_v37 }
  0x3a   :  { %208 = vmatpush.msra.mxu2 %v173_v38 }
  0x96   :  { %v128_v33 = vpop.f32.mrf.mxu0 }
  0x97   :  { %v129_v34 = vadd.f32 %v229_v32, %v128_v33 }
  0x99   :  { %v131_v35 = vmax.f32 %v129_v34, 0.0 }
  0x9b   :  { %168 = vmatmul.f32.vlgmr.msra.gmra.mxu1 %v131_v35 }
 0x118   :  { %v169_v40 = vpop.f32.mrf.mxu1 }
 0x119   :  { %v170_v41 = vadd.f32 %v230_v39, %v169_v40 }
 0x11b   :  { %v172_v42 = vmax.f32 %v170_v41, 0.0 }
 0x11d   :  { %209 = vmatmul.f32.vlgmr.msra.gmra.mxu2 %v172_v42 }
 0x1a0   :  { %v210_v44 = vpop.f32.mrf.mxu2 }
 0x1a1   :  { %v211_v45 = vadd.f32 %v231_v43, %v210_v44 }
 0x1a3   :  { %213 = vst [vmem:[%s436_s7] sm:$0xff] %v211_v45 }
 0x1a4   :  { %218 = vsyncpa [#allocation3], 1 }
 0x1a5   :  { %219 = vsyncpa [#allocation5], 1 }
 0x1a6   :  { %220 = vsyncpa [#allocation8], 1 }

</bundles_post_ra>
